<compile_context>
chip_gen: v7x
topology: tpu7x:2x2x1
jax: 0.10.0
libtpu: 0.0.40
codegen_flags: <defaults>
</compile_context>

<pallas_src>
import jax
import jax.numpy as jnp
from jax.experimental import pallas as pl
from jax.experimental.pallas import tpu as pltpu

EPS = 1e-5


# ---------------------------------------------------------------------------
# Pallas kernel 1: 3x3 conv (padding=1) on one (TH x WT) tile of one image,
# expressed as three fat-K bf16 MXU matmuls against a banded weight matrix,
# plus per-tile BatchNorm partial statistics (f32).
# ---------------------------------------------------------------------------
def _conv_stats_kernel(x_ref, m_ref, y_ref, s_ref):
    # x_ref : (1, 1, 1, TH+2, (WT+2)*Cin)  bf16  tile incl. 1-px halo; (w, cin) on lanes
    # m_ref : (3, (WT+2)*Cin, WT*Cout)     bf16  banded 3x3 weights, one slab per kh tap
    # y_ref : (TH, WT*Cout)                bf16  pre-BN conv output (lane-dense store)
    # s_ref : (1, 1, 1, 2, WT*Cout)        f32   per-tile [sum, sum_of_squares]
    TH = y_ref.shape[0]
    x = x_ref[0, 0, 0]                                        # (TH+2, (WT+2)*Cin)

    # Each kh tap is a contiguous sublane-offset row slice (no im2col copies); the
    # banded RHS applies the kw shifts and yields a lane-dense result directly,
    # with contraction depth K = (WT+2)*Cin on the MXU; accumulate in f32.
    acc = jnp.dot(x[0:TH], m_ref[0], preferred_element_type=jnp.float32)
    acc = acc + jnp.dot(x[1:TH + 1], m_ref[1], preferred_element_type=jnp.float32)
    acc = acc + jnp.dot(x[2:TH + 2], m_ref[2], preferred_element_type=jnp.float32)

    # BatchNorm partial statistics for this tile (f32); combined globally in the
    # wrapper so the statistics stay batch-global despite the parallel grid.
    s_ref[0, 0, 0, 0:1, :] = jnp.sum(acc, axis=0, keepdims=True)
    s_ref[0, 0, 0, 1:2, :] = jnp.sum(acc * acc, axis=0, keepdims=True)

    y_ref[...] = acc.astype(y_ref.dtype)


# ---------------------------------------------------------------------------
# Pallas kernel 2: fused BatchNorm affine + ReLU on the lane-dense layout,
# large row blocks, f32 VPU math.
# ---------------------------------------------------------------------------
def _bn_relu_kernel(y_ref, sc_ref, sh_ref, o_ref):
    # y_ref : (RB, W*Cout) bf16; sc_ref/sh_ref : (1, W*Cout) f32; o_ref : (RB, W*Cout) f32
    y = y_ref[...].astype(jnp.float32)
    o_ref[...] = jnp.maximum(y * sc_ref[...] + sh_ref[...], 0.0).astype(o_ref.dtype)


def _banded_weights(w_oihw, WT):
    # M[kh, p*Cin+ci, w*Cout+c] = w_oihw[c, ci, kh, p-w] for 0 <= p-w <= 2, else 0.
    # Translation-invariant in w, so one slab is shared by every W tile.
    Cout, Cin, _, _ = w_oihw.shape
    wp = jnp.arange(WT + 2)[None, :, None]
    wo = jnp.arange(WT)[None, None, :]
    dw = jnp.arange(3)[:, None, None]
    band = (wp == wo + dw).astype(w_oihw.dtype)               # (3, WT+2, WT)
    m = jnp.einsum("dpw,cikd->kpiwc", band, w_oihw)           # (3, WT+2, Cin, WT, Cout)
    return m.reshape(3, (WT + 2) * Cin, WT * Cout)


def _pick_tile(n, cap):
    """Largest divisor of n that is <= cap (prefer multiples of 8)."""
    if n <= cap:
        return n
    best, best8 = 1, 0
    for d in range(1, min(n, cap) + 1):
        if n % d == 0:
            best = d
            if d % 8 == 0:
                best8 = d
    return best8 if best8 else best


def _vmem_limit_bytes():
    # Per-generation VMEM budget: ~3/4 of physical, capped at 100 MiB
    # (~48 MiB on v7x / 64 MiB, ~96-100 MiB on v5e & v6e / 128 MiB).
    try:
        cap = int(pltpu.get_tpu_info().vmem_capacity_bytes)
    except Exception:
        cap = 64 * 1024 * 1024
    return max(32 * 1024 * 1024, min(100 * 1024 * 1024, (cap * 3) // 4))


def conv_bn_relu(x_nhwc, w_oihw, gamma, beta):
    N, H, W, Cin = x_nhwc.shape
    Cout = w_oihw.shape[0]
    out_dtype = x_nhwc.dtype
    vmem_limit = _vmem_limit_bytes()

    # Tile sizes: big row tiles amortize per-grid-step overhead and halo
    # duplication; WT bounds the banded slab (3*(WT+2)*Cin*WT*Cout*2 B, bf16)
    # and keeps its zero-density at 3/(WT+2). For large W/Cout, WT*Cout >= 256
    # fills the v6e/v7x 256-wide MXU; at this toy shape WT*Cout = 128.
    TH = _pick_tile(H, 256)
    WT = _pick_tile(W, 128)
    nHB = H // TH
    nWB = W // WT

    # Layout prep (fused by XLA under jit): cast to bf16, zero-pad for padding=1,
    # gather overlapping row/col tiles (+1 halo each side), flatten (WT+2, Cin)
    # onto lanes.
    xpad = jnp.pad(x_nhwc.astype(jnp.bfloat16), ((0, 0), (1, 1), (1, 1), (0, 0)))
    ridx = jnp.arange(nHB)[:, None] * TH + jnp.arange(TH + 2)[None, :]
    cidx = jnp.arange(nWB)[:, None] * WT + jnp.arange(WT + 2)[None, :]
    xb = xpad[:, ridx]                                  # (N, nHB, TH+2, W+2, Cin)
    xb = xb[:, :, :, cidx]                              # (N, nHB, TH+2, nWB, WT+2, Cin)
    xb = jnp.transpose(xb, (0, 1, 3, 2, 4, 5))          # (N, nHB, nWB, TH+2, WT+2, Cin)
    xb = xb.reshape(N, nHB, nWB, TH + 2, (WT + 2) * Cin)

    m_band = _banded_weights(w_oihw, WT).astype(jnp.bfloat16)   # (3, (WT+2)*Cin, WT*Cout)

    yconv, stats = pl.pallas_call(
        _conv_stats_kernel,
        out_shape=(jax.ShapeDtypeStruct((N * nHB * TH, nWB * WT * Cout), jnp.bfloat16),
                   jax.ShapeDtypeStruct((N, nHB, nWB, 2, WT * Cout), jnp.float32)),
        grid_spec=pltpu.PrefetchScalarGridSpec(
            num_scalar_prefetch=0,
            grid=(N, nHB, nWB),
            in_specs=[
                pl.BlockSpec((1, 1, 1, TH + 2, (WT + 2) * Cin),
                             lambda n, hb, wb: (n, hb, wb, 0, 0)),
                pl.BlockSpec((3, (WT + 2) * Cin, WT * Cout),
                             lambda n, hb, wb: (0, 0, 0)),
            ],
            out_specs=[
                pl.BlockSpec((TH, WT * Cout), lambda n, hb, wb: (n * nHB + hb, wb)),
                pl.BlockSpec((1, 1, 1, 2, WT * Cout),
                             lambda n, hb, wb: (n, hb, wb, 0, 0)),
            ],
        ),
        compiler_params=pltpu.CompilerParams(
            dimension_semantics=("parallel", "parallel", "parallel"),
            vmem_limit_bytes=vmem_limit),
    )(xb, m_band)

    # Global BatchNorm statistics (training mode, biased variance) from the
    # per-tile f32 partials. Tiny combine; stays in XLA.
    count = float(N * H * W)
    tot = jnp.sum(stats, axis=(0, 1))                           # (nWB, 2, WT*Cout)
    tot = tot.reshape(nWB, 2, WT, Cout).sum(axis=(0, 2))        # (2, Cout)
    mean = tot[0] / count
    var = jnp.maximum(tot[1] / count - mean * mean, 0.0)
    scale = gamma[0] * jax.lax.rsqrt(var + EPS)                 # (Cout,)
    shift = beta[0] - mean * scale                              # (Cout,)
    scale_b = jnp.tile(scale[None, :], (1, W))                  # (1, W*Cout)
    shift_b = jnp.tile(shift[None, :], (1, W))

    # BN + ReLU epilogue: lane-dense, up to 512-row blocks per grid step.
    RB = _pick_tile(N * H, 512)
    out2d = pl.pallas_call(
        _bn_relu_kernel,
        out_shape=jax.ShapeDtypeStruct((N * H, W * Cout), out_dtype),
        grid_spec=pltpu.PrefetchScalarGridSpec(
            num_scalar_prefetch=0,
            grid=((N * H) // RB,),
            in_specs=[
                pl.BlockSpec((RB, W * Cout), lambda i: (i, 0)),
                pl.BlockSpec((1, W * Cout), lambda i: (0, 0)),
                pl.BlockSpec((1, W * Cout), lambda i: (0, 0)),
            ],
            out_specs=pl.BlockSpec((RB, W * Cout), lambda i: (i, 0)),
        ),
        compiler_params=pltpu.CompilerParams(
            dimension_semantics=("parallel",),
            vmem_limit_bytes=vmem_limit),
    )(yconv, scale_b, shift_b)

    return out2d.reshape(N, H, W, Cout)


def bilinear_upsample_x2(x):
    # x: NCHW. Matches nn.Upsample(scale_factor=2, mode='bilinear',
    # align_corners=False): src = (dst + 0.5)/2 - 0.5, clamped at 0.
    # TODO(synk): upsample / pad / concat remain XLA glue feeding the Pallas conv.
    N, C, H, W = x.shape

    def src_idx(out_size, in_size):
        s = (jnp.arange(out_size, dtype=jnp.float32) + 0.5) * (in_size / out_size) - 0.5
        s = jnp.maximum(s, 0.0)
        i0 = jnp.floor(s).astype(jnp.int32)
        i1 = jnp.minimum(i0 + 1, in_size - 1)
        lam = s - i0.astype(jnp.float32)
        return i0, i1, lam

    h0, h1, lh = src_idx(2 * H, H)
    w0, w1, lw = src_idx(2 * W, W)
    lh = lh[None, None, :, None]
    rows = x[:, :, h0, :] * (1.0 - lh) + x[:, :, h1, :] * lh
    out = rows[:, :, :, w0] * (1.0 - lw) + rows[:, :, :, w1] * lw
    return out


@jax.jit
def up_forward(x1, x2, params):
    # x1, x2: NCHW (PyTorch convention), float32.
    x1u = bilinear_upsample_x2(x1)
    dX = x1u.shape[2] - x2.shape[2]
    dY = x1u.shape[3] - x2.shape[3]
    # Reproduces F.pad(x2, (dX//2, int(dX/2), dY//2, int(dY/2))) of the module:
    # last dim (W) gets (dX//2, int(dX/2)), dim 2 (H) gets (dY//2, int(dY/2)).
    x2p = jnp.pad(x2, ((0, 0), (0, 0),
                       (dY // 2, int(dY / 2)),
                       (dX // 2, int(dX / 2))))
    x = jnp.concatenate([x2p, x1u], axis=1)          # NCHW, channel_in channels
    x_nhwc = jnp.transpose(x, (0, 2, 3, 1))
    # Conv bias intentionally not applied: it cancels exactly under training-mode
    # BatchNorm (shifts mean identically, leaves variance unchanged).
    out_nhwc = conv_bn_relu(x_nhwc, params["w_oihw"],
                            params["gamma"], params["beta"])
    return jnp.transpose(out_nhwc, (0, 3, 1, 2))     # back to NCHW


def init_params(key, channel_in, channel_out):
    kw, kb, kg, kbe = jax.random.split(key, 4)
    w_oihw = jax.random.normal(kw, (channel_out, channel_in, 3, 3), jnp.float32) * 0.1
    bias = jax.random.normal(kb, (1, channel_out), jnp.float32) * 0.1
    gamma = 1.0 + 0.1 * jax.random.normal(kg, (1, channel_out), jnp.float32)
    beta = 0.1 * jax.random.normal(kbe, (1, channel_out), jnp.float32)
    return dict(w_oihw=w_oihw, bias=bias, gamma=gamma, beta=beta)


def reference(x1, x2, params):
    # Pure-JAX f32 reference of the same forward (with the conv bias, which the
    # training-mode BatchNorm cancels), for a sanity check.
    x1u = bilinear_upsample_x2(x1)
    dX = x1u.shape[2] - x2.shape[2]
    dY = x1u.shape[3] - x2.shape[3]
    x2p = jnp.pad(x2, ((0, 0), (0, 0),
                       (dY // 2, int(dY / 2)),
                       (dX // 2, int(dX / 2))))
    x = jnp.concatenate([x2p, x1u], axis=1)
    x_nhwc = jnp.transpose(x, (0, 2, 3, 1))
    w_hwio = jnp.transpose(params["w_oihw"], (2, 3, 1, 0))
    y = jax.lax.conv_general_dilated(
        x_nhwc, w_hwio, (1, 1), "SAME",
        dimension_numbers=("NHWC", "HWIO", "NHWC")) + params["bias"][0]
    mean = jnp.mean(y, axis=(0, 1, 2), keepdims=True)
    var = jnp.mean((y - mean) ** 2, axis=(0, 1, 2), keepdims=True)
    y = (y - mean) * jax.lax.rsqrt(var + EPS) * params["gamma"][0] + params["beta"][0]
    y = jnp.maximum(y, 0.0)
    return jnp.transpose(y, (0, 3, 1, 2))


if __name__ == "__main__":
    key = jax.random.PRNGKey(0)
    k1, k2, kp = jax.random.split(key, 3)
    # x1: low-res feature map (upsampled 2x); x2: skip connection at full res.
    x1 = jax.random.normal(k1, (2, 4, 8, 8), jnp.float32)
    x2 = jax.random.normal(k2, (2, 4, 16, 16), jnp.float32)
    channel_in = x1.shape[1] + x2.shape[1]   # 8 (concatenated channels)
    channel_out = 8
    params = init_params(kp, channel_in, channel_out)

    out = jax.block_until_ready(up_forward(x1, x2, params))
    assert out.shape == (2, channel_out, 16, 16), out.shape

    ref = jax.block_until_ready(reference(x1, x2, params))
    err = float(jnp.max(jnp.abs(out - ref)))
    # Tolerance loosened vs. a pure-f32 pipeline: inputs/weights and the yconv
    # intermediate are bf16 (f32 accumulation and BN statistics).
    assert bool(jnp.allclose(out, ref, atol=5e-2, rtol=5e-2)), err

    print("KERNEL_OK")
</pallas_src>

<mosaic_0001>
module attributes {stable_mosaic.version = 11 : i64} {
  func.func @_conv_stats_kernel(%arg0: i32, %arg1: i32, %arg2: i32, %arg3: memref<1x1x1x18x144xbf16, #tpu.memory_space<vmem>>, %arg4: memref<3x144x128xbf16, #tpu.memory_space<vmem>>, %arg5: memref<16x128xbf16, #tpu.memory_space<vmem>>, %arg6: memref<1x1x1x2x128xf32, #tpu.memory_space<vmem>>) attributes {dimension_semantics = [#tpu.dimension_semantics<parallel>, #tpu.dimension_semantics<parallel>, #tpu.dimension_semantics<parallel>], iteration_bounds = array<i64: 2, 1, 1>, scalar_prefetch = 0 : i64, scratch_operands = 0 : i64, tpu.core_type = #tpu.core_type<tc>, window_params = [{transform_indices = @transform_0, window_bounds = array<i64: 1, 1, 1, 18, 144>}, {pipeline_mode = #tpu.pipeline_mode<synchronous>, transform_indices = @transform_1, window_bounds = array<i64: 3, 144, 128>}, {transform_indices = @transform_2, window_bounds = array<i64: 16, 128>}, {transform_indices = @transform_3, window_bounds = array<i64: 1, 1, 1, 2, 128>}]} {
    %c0 = arith.constant 0 : index
    %c0_0 = arith.constant 0 : index
    %c0_1 = arith.constant 0 : index
    %c0_2 = arith.constant 0 : index
    %c0_3 = arith.constant 0 : index
    %0 = vector.load %arg3[%c0, %c0_0, %c0_1, %c0_2, %c0_3] : memref<1x1x1x18x144xbf16, #tpu.memory_space<vmem>>, vector<1x1x1x18x144xbf16>
    %1 = vector.shape_cast %0 : vector<1x1x1x18x144xbf16> to vector<18x144xbf16>
    %2 = vector.extract_strided_slice %1 {offsets = [0, 0], sizes = [16, 144], strides = [1, 1]} : vector<18x144xbf16> to vector<16x144xbf16>
    %c0_4 = arith.constant 0 : index
    %c0_5 = arith.constant 0 : index
    %c0_6 = arith.constant 0 : index
    %3 = vector.load %arg4[%c0_4, %c0_5, %c0_6] : memref<3x144x128xbf16, #tpu.memory_space<vmem>>, vector<1x144x128xbf16>
    %4 = vector.shape_cast %3 : vector<1x144x128xbf16> to vector<144x128xbf16>
    %cst = arith.constant dense<0.000000e+00> : vector<16x128xf32>
    %5 = tpu.matmul %2, %4, %cst {dimension_numbers = #tpu.dot_dimension_numbers<[1], [0], [0], [1], [0, 0, 1, 1], [], []>} : vector<16x144xbf16>, vector<144x128xbf16>, vector<16x128xf32> -> vector<16x128xf32>
    %6 = vector.extract_strided_slice %1 {offsets = [1, 0], sizes = [16, 144], strides = [1, 1]} : vector<18x144xbf16> to vector<16x144xbf16>
    %c1 = arith.constant 1 : index
    %c0_7 = arith.constant 0 : index
    %c0_8 = arith.constant 0 : index
    %7 = vector.load %arg4[%c1, %c0_7, %c0_8] : memref<3x144x128xbf16, #tpu.memory_space<vmem>>, vector<1x144x128xbf16>
    %8 = vector.shape_cast %7 : vector<1x144x128xbf16> to vector<144x128xbf16>
    %cst_9 = arith.constant dense<0.000000e+00> : vector<16x128xf32>
    %9 = tpu.matmul %6, %8, %cst_9 {dimension_numbers = #tpu.dot_dimension_numbers<[1], [0], [0], [1], [0, 0, 1, 1], [], []>} : vector<16x144xbf16>, vector<144x128xbf16>, vector<16x128xf32> -> vector<16x128xf32>
    %10 = arith.addf %5, %9 : vector<16x128xf32>
    %11 = vector.extract_strided_slice %1 {offsets = [2, 0], sizes = [16, 144], strides = [1, 1]} : vector<18x144xbf16> to vector<16x144xbf16>
    %c2 = arith.constant 2 : index
    %c0_10 = arith.constant 0 : index
    %c0_11 = arith.constant 0 : index
    %12 = vector.load %arg4[%c2, %c0_10, %c0_11] : memref<3x144x128xbf16, #tpu.memory_space<vmem>>, vector<1x144x128xbf16>
    %13 = vector.shape_cast %12 : vector<1x144x128xbf16> to vector<144x128xbf16>
    %cst_12 = arith.constant dense<0.000000e+00> : vector<16x128xf32>
    %14 = tpu.matmul %11, %13, %cst_12 {dimension_numbers = #tpu.dot_dimension_numbers<[1], [0], [0], [1], [0, 0, 1, 1], [], []>} : vector<16x144xbf16>, vector<144x128xbf16>, vector<16x128xf32> -> vector<16x128xf32>
    %15 = arith.addf %10, %14 : vector<16x128xf32>
    %cst_13 = arith.constant dense<0.000000e+00> : vector<128xf32>
    %16 = vector.multi_reduction <add>, %15, %cst_13 [0] : vector<16x128xf32> to vector<128xf32>
    %17 = vector.shape_cast %16 : vector<128xf32> to vector<1x128xf32>
    %c0_14 = arith.constant 0 : index
    %c0_15 = arith.constant 0 : index
    %c0_16 = arith.constant 0 : index
    %c0_17 = arith.constant 0 : index
    %c0_18 = arith.constant 0 : index
    %18 = vector.load %arg6[%c0_14, %c0_15, %c0_16, %c0_17, %c0_18] : memref<1x1x1x2x128xf32, #tpu.memory_space<vmem>>, vector<1x1x1x1x128xf32>
    %19 = vector.shape_cast %18 : vector<1x1x1x1x128xf32> to vector<1x128xf32>
    %20 = vector.shape_cast %17 : vector<1x128xf32> to vector<1x1x1x1x128xf32>
    tpu.vector_store %arg6[%c0_14, %c0_15, %c0_16, %c0_17, %c0_18], %20 {strides = array<i32>} : memref<1x1x1x2x128xf32, #tpu.memory_space<vmem>>, vector<1x1x1x1x128xf32>,
    %21 = arith.mulf %15, %15 : vector<16x128xf32>
    %cst_19 = arith.constant dense<0.000000e+00> : vector<128xf32>
    %22 = vector.multi_reduction <add>, %21, %cst_19 [0] : vector<16x128xf32> to vector<128xf32>
    %23 = vector.shape_cast %22 : vector<128xf32> to vector<1x128xf32>
    %c0_20 = arith.constant 0 : index
    %c0_21 = arith.constant 0 : index
    %c0_22 = arith.constant 0 : index
    %c1_23 = arith.constant 1 : index
    %c0_24 = arith.constant 0 : index
    %24 = vector.load %arg6[%c0_20, %c0_21, %c0_22, %c1_23, %c0_24] : memref<1x1x1x2x128xf32, #tpu.memory_space<vmem>>, vector<1x1x1x1x128xf32>
    %25 = vector.shape_cast %24 : vector<1x1x1x1x128xf32> to vector<1x128xf32>
    %26 = vector.shape_cast %23 : vector<1x128xf32> to vector<1x1x1x1x128xf32>
    tpu.vector_store %arg6[%c0_20, %c0_21, %c0_22, %c1_23, %c0_24], %26 {strides = array<i32>} : memref<1x1x1x2x128xf32, #tpu.memory_space<vmem>>, vector<1x1x1x1x128xf32>,
    %27 = arith.truncf %15 : vector<16x128xf32> to vector<16x128xbf16>
    %c0_25 = arith.constant 0 : index
    %c0_26 = arith.constant 0 : index
    %28 = vector.load %arg5[%c0_25, %c0_26] : memref<16x128xbf16, #tpu.memory_space<vmem>>, vector<16x128xbf16>
    tpu.vector_store %arg5[%c0_25, %c0_26], %27 {strides = array<i32>} : memref<16x128xbf16, #tpu.memory_space<vmem>>, vector<16x128xbf16>,
    return
  }
  func.func @transform_0(%arg0: i32, %arg1: i32, %arg2: i32) -> (i32, i32, i32, i32, i32) {
    %c0_i32 = arith.constant 0 : i32
    %c0_i32_0 = arith.constant 0 : i32
    %c0_i32_1 = arith.constant 0 : i32
    return %arg0, %arg1, %arg2, %c0_i32, %c0_i32_0 : i32, i32, i32, i32, i32
  }
  func.func @transform_1(%arg0: i32, %arg1: i32, %arg2: i32) -> (i32, i32, i32) {
    %c0_i32 = arith.constant 0 : i32
    %c0_i32_0 = arith.constant 0 : i32
    %c0_i32_1 = arith.constant 0 : i32
    %c0_i32_2 = arith.constant 0 : i32
    return %c0_i32, %c0_i32_0, %c0_i32_1 : i32, i32, i32
  }
  func.func @transform_2(%arg0: i32, %arg1: i32, %arg2: i32) -> (i32, i32) {
    %c1_i32 = arith.constant 1 : i32
    %0 = arith.muli %arg0, %c1_i32 : i32
    %1 = arith.addi %0, %arg1 : i32
    %c0_i32 = arith.constant 0 : i32
    return %1, %arg2 : i32, i32
  }
  func.func @transform_3(%arg0: i32, %arg1: i32, %arg2: i32) -> (i32, i32, i32, i32, i32) {
    %c0_i32 = arith.constant 0 : i32
    %c0_i32_0 = arith.constant 0 : i32
    %c0_i32_1 = arith.constant 0 : i32
    return %arg0, %arg1, %arg2, %c0_i32, %c0_i32_0 : i32, i32, i32, i32, i32
  }
}

module attributes {stable_mosaic.version = 11 : i64} {
  func.func @_bn_relu_kernel(%arg0: i32, %arg1: memref<32x128xbf16, #tpu.memory_space<vmem>>, %arg2: memref<1x128xf32, #tpu.memory_space<vmem>>, %arg3: memref<1x128xf32, #tpu.memory_space<vmem>>, %arg4: memref<32x128xf32, #tpu.memory_space<vmem>>) attributes {dimension_semantics = [#tpu.dimension_semantics<parallel>], iteration_bounds = array<i64: 1>, scalar_prefetch = 0 : i64, scratch_operands = 0 : i64, tpu.core_type = #tpu.core_type<tc>, window_params = [{transform_indices = @transform_0, window_bounds = array<i64: 32, 128>}, {pipeline_mode = #tpu.pipeline_mode<synchronous>, transform_indices = @transform_1, window_bounds = array<i64: 1, 128>}, {pipeline_mode = #tpu.pipeline_mode<synchronous>, transform_indices = @transform_2, window_bounds = array<i64: 1, 128>}, {transform_indices = @transform_3, window_bounds = array<i64: 32, 128>}]} {
    %c0 = arith.constant 0 : index
    %c0_0 = arith.constant 0 : index
    %0 = vector.load %arg1[%c0, %c0_0] : memref<32x128xbf16, #tpu.memory_space<vmem>>, vector<32x128xbf16>
    %1 = arith.extf %0 : vector<32x128xbf16> to vector<32x128xf32>
    %c0_1 = arith.constant 0 : index
    %c0_2 = arith.constant 0 : index
    %2 = vector.load %arg2[%c0_1, %c0_2] : memref<1x128xf32, #tpu.memory_space<vmem>>, vector<1x128xf32>
    %3 = vector.broadcast %2 : vector<1x128xf32> to vector<32x128xf32>
    %4 = arith.mulf %1, %3 : vector<32x128xf32>
    %c0_3 = arith.constant 0 : index
    %c0_4 = arith.constant 0 : index
    %5 = vector.load %arg3[%c0_3, %c0_4] : memref<1x128xf32, #tpu.memory_space<vmem>>, vector<1x128xf32>
    %6 = vector.broadcast %5 : vector<1x128xf32> to vector<32x128xf32>
    %7 = arith.addf %4, %6 : vector<32x128xf32>
    %cst = arith.constant 0.000000e+00 : f32
    %8 = vector.broadcast %cst : f32 to vector<32x128xf32>
    %9 = arith.maximumf %7, %8 : vector<32x128xf32>
    %c0_5 = arith.constant 0 : index
    %c0_6 = arith.constant 0 : index
    %10 = vector.load %arg4[%c0_5, %c0_6] : memref<32x128xf32, #tpu.memory_space<vmem>>, vector<32x128xf32>
    tpu.vector_store %arg4[%c0_5, %c0_6], %9 {strides = array<i32>} : memref<32x128xf32, #tpu.memory_space<vmem>>, vector<32x128xf32>,
    return
  }
  func.func @transform_0(%arg0: i32) -> (i32, i32) {
    %c0_i32 = arith.constant 0 : i32
    %c0_i32_0 = arith.constant 0 : i32
    return %arg0, %c0_i32 : i32, i32
  }
  func.func @transform_1(%arg0: i32) -> (i32, i32) {
    %c0_i32 = arith.constant 0 : i32
    %c0_i32_0 = arith.constant 0 : i32
    %c0_i32_1 = arith.constant 0 : i32
    return %c0_i32, %c0_i32_0 : i32, i32
  }
  func.func @transform_2(%arg0: i32) -> (i32, i32) {
    %c0_i32 = arith.constant 0 : i32
    %c0_i32_0 = arith.constant 0 : i32
    %c0_i32_1 = arith.constant 0 : i32
    return %c0_i32, %c0_i32_0 : i32, i32
  }
  func.func @transform_3(%arg0: i32) -> (i32, i32) {
    %c0_i32 = arith.constant 0 : i32
    %c0_i32_0 = arith.constant 0 : i32
    return %arg0, %c0_i32 : i32, i32
  }
}

</mosaic_0001>

<bundles_post_ra>
// kernel: up_forward.2
= control target key start
LH: loop header
LB: loop body
LE: loop exit
PB: predicated region body
PF: predicated region fallthrough
CT: control target
= control target key end

     0   :  { %s1037_s12 = smov 0   ;;  %s1039_s13 = smov 0   ;;  %s1208_s0 = inlined_call_operand.vmem [shape: bf16[2,1,1,18,144], index: 0, kind: input, shape index: {}]   ;;  %s1209_s1 = inlined_call_operand.vmem [shape: bf16[3,144,128], index: 1, kind: input, shape index: {}]   ;;  %s1210_s2 = inlined_call_operand.vmem [shape: bf16[32,128], index: 2, kind: output, shape index: {0}]   ;;  %s1211_s3 = inlined_call_operand.vmem [shape: f32[2,1,1,2,128], index: 3, kind: output, shape index: {1}]  }
   0x1   :  { %s1041_s14 = smov 0  }
   0x2 LB: > { %s33_s15 = sadd.s32 1, %s1010_s13  ;;  %p842_p0 = scmp.ge.s32.totalorder %s1014_s14, 1  ;;  %s1014_s14 = sphi %s1041_s14, %s14_s14   ;;  %s1010_s13 = sphi %s1039_s13, %s1213_s13   ;;  %s1006_s12 = sphi %s1037_s12, %s1212_s12  }
   0x3   : > { %p35_p1 = scmp.ge.s32.totalorder %s33_s15, 2  ;;  %p179_p2 = scmp.lt.s32.totalorder %s1014_s14, 3 }
   0x5   : > { %s1215_s15 = smov (%p35_p1, %s33_s15), 0  ;;  %p180_p3 = pnand %p842_p0, %p179_p2 }
   0x6   : > { %v960_v0 = vld [vmem:[%s1209_s1] sm:$0xff] (!%p180_p3)   ;;  %v1016_v1 = vmov (!%p180_p3), 0   ;;  %p225_p4 = scmp.lt.s32.totalorder (!%p180_p3), %s1006_s12, 1  ;;  %v961_v2 = vld [vmem:[%s1209_s1 + $0x8] sm:$0xff] (!%p180_p3)   ;;  %v962_v3 = vld [vmem:[%s1209_s1 + $0x10] sm:$0xff] (!%p180_p3)   ;;  %vm393_vm0 = vcmask (!%p180_p3), 130048  }
   0x7   : > { %183 = sbr.rel (%p180_p3) target bundleno = 312 (0x138), region = 28  ;;  %495 = vmatprep.subr.bf16.mxu0 (!%p180_p3), %v1016_v1  ;;  %397 = vmatprep.subr.bf16.mxu1 (!%p180_p3), %v1016_v1  ;;  %v963_v4 = vld [vmem:[%s1209_s1 + $0x18] sm:$0xff] (!%p180_p3)   ;;  %v969_v5 = vld [vmem:[%s1209_s1 + $0x48] sm:$0xff] (!%p180_p3)   ;;  %v974_v7 = vld [vmem:[%s1209_s1 + $0x50] sm:$0xff] (!%p180_p3)   ;;  %vm313_vm1 = vsmask.f32 (!%p180_p3), 7424 }
   0x8   : > { %496 = vmatpush1.bf16.msra.mxu0 (!%p180_p3), %v960_v0  ;;  %398 = vmatpush1.bf16.msra.mxu1 (!%p180_p3), %v969_v5  ;;  %v964_v8 = vld [vmem:[%s1209_s1 + $0x20] sm:$0xff] (!%p180_p3)   ;;  %v976_v9 = vld [vmem:[%s1209_s1 + $0x58] sm:$0xff] (!%p180_p3)   ;;  %v965_v10 = vld [vmem:[%s1209_s1 + $0x28] sm:$0xff] (!%p180_p3)   ;;  %vm555_vm2 = vcmask (!%p180_p3), 1046528  }
   0x9   : > { %497 = vmatprep.subr.bf16.mxu0 (!%p180_p3), %v1016_v1  ;;  %399 = vmatprep.subr.bf16.mxu1 (!%p180_p3), %v1016_v1  ;;  %v978_v11 = vld [vmem:[%s1209_s1 + $0x60] sm:$0xff] (!%p180_p3)   ;;  %v966_v12 = vld [vmem:[%s1209_s1 + $0x30] sm:$0xff] (!%p180_p3)   ;;  %v980_v14 = vld [vmem:[%s1209_s1 + $0x68] sm:$0xff] (!%p180_p3)  }
   0xa   : > { %v967_v15 = vld [vmem:[%s1209_s1 + $0x38] sm:$0xff] (!%p180_p3)   ;;  %v982_v18 = vld [vmem:[%s1209_s1 + $0x70] sm:$0xff] (!%p180_p3)   ;;  %v968_v22 = vld [vmem:[%s1209_s1 + $0x40] sm:$0xff] (!%p180_p3)  }
   0xb   : > { %v984_v25 = vld [vmem:[%s1209_s1 + $0x78] sm:$0xff] (!%p180_p3)   ;;  %v973_v31 = vld [vmem:[%s1209_s1 + $0x90] sm:$0xff] (!%p180_p3)   ;;  %v986_v33 = vld [vmem:[%s1209_s1 + $0x80] sm:$0xff] (!%p180_p3)  }
   0xc   : > { %498 = vmatpush1.bf16.msra.mxu0 (!%p180_p3), %v961_v2  ;;  %400 = vmatpush1.bf16.msra.mxu1 (!%p180_p3), %v974_v7  ;;  %v975_v38 = vld [vmem:[%s1209_s1 + $0x98] sm:$0xff] (!%p180_p3)   ;;  %v988_v39 = vld [vmem:[%s1209_s1 + $0x88] sm:$0xff] (!%p180_p3)   ;;  %v977_v42 = vld [vmem:[%s1209_s1 + $0xa0] sm:$0xff] (!%p180_p3)  }
   0xd   : > { %499 = vmatprep.subr.bf16.mxu0 (!%p180_p3), %v1016_v1  ;;  %401 = vmatprep.subr.bf16.mxu1 (!%p180_p3), %v1016_v1  ;;  %v979_v44 = vld [vmem:[%s1209_s1 + $0xa8] sm:$0xff] (!%p180_p3)   ;;  %v981_v45 = vld [vmem:[%s1209_s1 + $0xb0] sm:$0xff] (!%p180_p3)   ;;  %v983_v46 = vld [vmem:[%s1209_s1 + $0xb8] sm:$0xff] (!%p180_p3)  }
   0xe   : > { %s1068_s20 = scalar_select %p225_p4, %s1006_s12, 1  ;;  %v985_v47 = vld [vmem:[%s1209_s1 + $0xc0] sm:$0xff]   ;;  %v987_v48 = vld [vmem:[%s1209_s1 + $0xc8] sm:$0xff]   ;;  %v991_v49 = vld [vmem:[%s1209_s1 + $0xd0] sm:$0xff]  }
  0x10   : > { %s934_s21 = smul.u32 24, %s1068_s20  ;;  %500 = vmatpush1.bf16.msra.mxu0 %v962_v3  ;;  %402 = vmatpush1.bf16.msra.mxu1 %v976_v9 }
  0x11   : > { %501 = vmatprep.subr.bf16.mxu0 %v1016_v1  ;;  %403 = vmatprep.subr.bf16.mxu1 %v1016_v1 }
  0x12   : > { %s1078_s26 = scalar_lea.vmem %s1208_s0, %s934_s21 }
  0x13   : > { %v970_v6 = vld [vmem:[%s1078_s26 + $0x4] ss:$8 sps:$4 sm:$0xff]   ;;  %v262_v19 = vld [vmem:[%s1078_s26 + $0x10] sm:$0x11]  ;;  %v1127_v21 = vld [vmem:[%s1078_s26] ss:$8 sps:$4 sm:$0xff]  }
  0x14   : > { %888 = vmatprep.mubr.msk.bf16.mxu0 %vm393_vm0, %v970_v6  ;;  %502 = vmatpush1.bf16.msra.mxu0 %v963_v4  ;;  %v329_v13 = vshll.u32 %v970_v6, 16  ;;  %v327_v16 = vshrl.u32 %v970_v6, 16  ;;  %v868_v20 = vcombine.high %v262_v19, %v262_v19  ;;  %v867_v26 = vcombine.low %v262_v19, %v262_v19  ;;  %s844_s26 = sshll.u32 %s1006_s12, 1  ;;  %s846_s12 = sshll.u32 %s1068_s20, 1 }
  0x15   : > { %503 = vmatprep.subr.bf16.mxu0 %v1016_v1  ;;  %404 = vmatpush1.bf16.msra.mxu1 %v978_v11  ;;  %v317_v27 = vshll.u32 %v1127_v21, 16  ;;  %v559_v28 = vrot.slane %v970_v6, 1  ;;  %v315_v34 = vshrl.u32 %v1127_v21, 16  ;;  %v556_v50 = vrot.slane %v1127_v21, 1  ;;  %p240_p5 = scmp.lt.s32.totalorder %s844_s26, 3  ;;  %s258_s11 = scalar_lea.vmem %s1211_s3, %s846_s12 }
  0x16   : > { %405 = vmatprep.subr.bf16.mxu1 %v1016_v1  ;;  %v331_v17 = vrot.slane %v329_v13, 1  ;;  %v334_v24 = vshll.u32 %v868_v20, 16  ;;  %v560_v29 = vrot.slane %v868_v20, 1  ;;  %v322_v36 = vshll.u32 %v867_v26, 16 }
  0x17   : > { %v319_v35 = vrot.slane %v317_v27, 1  ;;  %v557_v51 = vrot.slane %v867_v26, 1  ;;  %s1217_s26 = smov (!%p240_p5, %s844_s26), 3 }
  0x18   : > { %504 = vmatpush1.bf16.msra.mxu0 %v964_v8  ;;  %v332_v23 = vor.u32 %v331_v17, %v327_v16  ;;  %v336_v30 = vrot.slane %v334_v24, 1  ;;  %v561_v37 = vsel %vm555_vm2, %v559_v28, %v560_v29  ;;  %v324_v41 = vrot.slane %v322_v36, 1  ;;  %s845_s5 = sshll.u32 %s1217_s26, 2 }
  0x19   : > { %505 = vmatprep.subr.bf16.mxu0 %v1016_v1  ;;  %406 = vmatpush1.bf16.msra.mxu1 %v980_v14  ;;  %v320_v40 = vor.u32 %v319_v35, %v315_v34  ;;  %v558_v52 = vsel %vm555_vm2, %v556_v50, %v557_v51  ;;  %s246_s8 = scalar_lea.vmem %s1210_s2, %s845_s5 }
  0x1a   : > { %407 = vmatprep.subr.bf16.mxu1 %v1016_v1  ;;  %v337_v32 = vsel %vm313_vm1, %v332_v23, %v336_v30 }
  0x1b   : > { %878 = vmatprep.mubr.msk.bf16.mxu1 %vm393_vm0, %v337_v32  ;;  %v325_v43 = vsel %vm313_vm1, %v320_v40, %v324_v41 }
  0x1c   : > { %506 = vmatpush1.bf16.msra.mxu0 %v965_v10 }
  0x1d   : > { %507 = vmatprep.subr.bf16.mxu0 %v1016_v1  ;;  %408 = vmatpush1.bf16.msra.mxu1 %v982_v18 }
  0x1e   : > { %409 = vmatprep.subr.bf16.mxu1 %v1016_v1 }
  0x20   : > { %508 = vmatpush1.bf16.msra.mxu0 %v966_v12 }
  0x21   : > { %509 = vmatprep.subr.bf16.mxu0 %v1016_v1  ;;  %410 = vmatpush1.bf16.msra.mxu1 %v984_v25 }
  0x22   : > { %411 = vmatprep.subr.bf16.mxu1 %v1016_v1 }
  0x24   : > { %510 = vmatpush1.bf16.msra.mxu0 %v967_v15 }
  0x25   : > { %511 = vmatprep.subr.bf16.mxu0 %v1016_v1  ;;  %412 = vmatpush1.bf16.msra.mxu1 %v986_v33 }
  0x26   : > { %413 = vmatprep.subr.bf16.mxu1 %v1016_v1 }
  0x28   : > { %512 = vmatpush1.bf16.msra.mxu0 %v968_v22 }
  0x29   : > { %620 = vmatprep.subr.bf16.mxu0 %v1016_v1  ;;  %414 = vmatpush1.bf16.msra.mxu1 %v988_v39 }
  0x2b   : > { %528 = vmatmul.mubr.bf16.vlgmr.msra.gmra.mrb[0].mxu0 %v1127_v21 }
  0x2c   : > { %621 = vmatpush1.bf16.msra.mxu0 %v973_v31  ;;  %916 = vmatprep.mubr.msk.bf16.mxu0 %vm393_vm0, %v561_v37 }
  0x2d   : > { %622 = vmatprep.subr.bf16.mxu0 %v1016_v1  ;;  %430 = vmatmul.mubr.bf16.vlgmr.msra.gmra.mrb[0].mxu1 %v325_v43 }
  0x30   : > { %623 = vmatpush1.bf16.msra.mxu0 %v975_v38 }
  0x31   : > { %624 = vmatprep.subr.bf16.mxu0 %v1016_v1 }
  0x34   : > { %625 = vmatpush1.bf16.msra.mxu0 %v977_v42 }
  0x35   : > { %626 = vmatprep.subr.bf16.mxu0 %v1016_v1 }
  0x38   : > { %627 = vmatpush1.bf16.msra.mxu0 %v979_v44 }
  0x39   : > { %628 = vmatprep.subr.bf16.mxu0 %v1016_v1 }
  0x3c   : > { %629 = vmatpush1.bf16.msra.mxu0 %v981_v45 }
  0x3d   : > { %630 = vmatprep.subr.bf16.mxu0 %v1016_v1 }
  0x40   : > { %631 = vmatpush1.bf16.msra.mxu0 %v983_v46 }
  0x41   : > { %632 = vmatprep.subr.bf16.mxu0 %v1016_v1 }
  0x44   : > { %633 = vmatpush1.bf16.msra.mxu0 %v985_v47 }
  0x45   : > { %634 = vmatprep.subr.bf16.mxu0 %v1016_v1 }
  0x48   : > { %635 = vmatpush1.bf16.msra.mxu0 %v987_v48 }
  0x49   : > { %636 = vmatprep.subr.bf16.mxu0 %v1016_v1 }
  0x4c   : > { %637 = vmatpush1.bf16.msra.mxu0 %v991_v49 }
  0x4f   : > { %653 = vmatmul.mubr.bf16.vlgmr.msra.gmra.mrb[0].mxu0 %v558_v52 }
 0x100   : > { %v431_v53 = vpop.f32.mrb[0].mxu1 }
 0x101   : > { %v433_v54 = vpop.f32.mrb[1].mxu1 }
 0x102   : > { %v434_v55 = vpop.f32.mrb[2].mxu1 }
 0x103   : > { %v436_v56 = vpop.f32.mrb[3].mxu1 }
 0x122   : > { %v654_v57 = vpop.f32.mrb[0].mxu0 }
 0x123   : > { %v928_v58 = vadd.f32 %v654_v57, %v431_v53  ;;  %v656_v59 = vpop.f32.mrb[1].mxu0 }
 0x124   : > { %v657_v60 = vpop.f32.mrb[2].mxu0 }
 0x125   : > { %v929_v61 = vadd.f32 %v657_v60, %v434_v55  ;;  %v659_v62 = vpop.f32.mrb[3].mxu0  ;;  %v671_v63 = vmul.f32 %v928_v58, %v928_v58 }
 0x127   : > { %v663_v0 = vadd.f32 %v929_v61, %v928_v58  ;;  %v672_v1 = vmul.f32 %v929_v61, %v929_v61  ;;  %v926_v2 = vpack.c.bf16 %v929_v61, %v928_v58 }
 0x129   : > { %v664_v3 = vrot.slane %v663_v0, 4  ;;  %v673_v4 = vadd.f32 %v672_v1, %v671_v63  ;;  %927 = vst [vmem:[%s246_s8] sm:$0xff] %v926_v2  }
 0x12b   : > { %v665_v5 = vadd.f32 %v664_v3, %v663_v0  ;;  %v674_v6 = vrot.slane %v673_v4, 4 }
 0x12d   : > { %v666_v7 = vrot.slane %v665_v5, 2  ;;  %v675_v8 = vadd.f32 %v674_v6, %v673_v4 }
 0x12f   : > { %v667_v9 = vadd.f32 %v666_v7, %v665_v5  ;;  %v676_v10 = vrot.slane %v675_v8, 2 }
 0x131   : > { %v668_v11 = vrot.slane %v667_v9, 1  ;;  %v677_v12 = vadd.f32 %v676_v10, %v675_v8 }
 0x133   : > { %v669_v13 = vadd.f32 %v668_v11, %v667_v9  ;;  %v678_v14 = vrot.slane %v677_v12, 1 }
 0x135   : > { %670 = vst [vmem:[%s258_s11] sm:$0x1] %v669_v13  ;;  %v679_v15 = vadd.f32 %v678_v14, %v677_v12 }
 0x137   : > { %680 = vst [vmem:[%s258_s11 + $0x1] sm:$0x1] %v679_v15 }
 0x138 PF: > { %s14_s14 = sadd.s32 1, %s1014_s14   ;;  %s1212_s12 = smov %s1010_s13 }
 0x139   : > { %p11_p6 = scmp.ge.s32.totalorder %s14_s14, 4   ;;  %s1213_s13 = smov %s1215_s15 }
 0x13b   :  { %13 = sbr.rel (!%p11_p6) target bundleno = 2 (0x2), region = 72 }

// kernel: up_forward.3
= control target key start
LH: loop header
LB: loop body
LE: loop exit
PB: predicated region body
PF: predicated region fallthrough
CT: control target
= control target key end

     0   :  { %s111_s0 = inlined_call_operand.vmem [shape: bf16[32,128], index: 0, kind: input, shape index: {}]   ;;  %s112_s1 = inlined_call_operand.vmem [shape: f32[1,128], index: 1, kind: input, shape index: {}]   ;;  %s113_s2 = inlined_call_operand.vmem [shape: f32[1,128], index: 2, kind: input, shape index: {}]   ;;  %s114_s3 = inlined_call_operand.vmem [shape: f32[32,128], index: 3, kind: output, shape index: {}]  }
   0x1   :  { %v59_v0 = vld [vmem:[%s111_s0] sm:$0xff]   ;;  %v66_v4 = vld [vmem:[%s111_s0 + $0x8] sm:$0xff]  }
   0x2   :  { %v56_v1 = vld [vmem:[%s112_s1] ss:$0 sm:$0xff]  ;;  %v60_v2 = vunpack.c.l.bf16 %v59_v0  ;;  %v61_v3 = vunpack.c.h.bf16 %v59_v0  ;;  %v64_v6 = vunpack.c.l.bf16 %v66_v4  ;;  %v65_v7 = vunpack.c.h.bf16 %v66_v4 }
   0x3   :  { %v57_v5 = vld [vmem:[%s113_s2] ss:$0 sm:$0xff] }
   0x4   :  { %v29_v8 = vmul.f32 %v60_v2, %v56_v1  ;;  %v30_v9 = vmul.f32 %v61_v3, %v56_v1  ;;  %v31_v10 = vmul.f32 %v64_v6, %v56_v1  ;;  %v32_v11 = vmul.f32 %v65_v7, %v56_v1 }
   0x6   :  { %v40_v12 = vadd.f32 %v57_v5, %v29_v8  ;;  %v41_v13 = vadd.f32 %v57_v5, %v30_v9  ;;  %v42_v14 = vadd.f32 %v57_v5, %v31_v10  ;;  %v43_v15 = vadd.f32 %v57_v5, %v32_v11 }
   0x8   :  { %v44_v16 = vmax.f32 %v40_v12, 0.0  ;;  %v45_v17 = vmax.f32 %v41_v13, 0.0  ;;  %v46_v18 = vmax.f32 %v42_v14, 0.0  ;;  %v47_v19 = vmax.f32 %v43_v15, 0.0 }
   0xa   :  { %48 = vst [vmem:[%s114_s3] sm:$0xff] %v44_v16  ;;  %49 = vst [vmem:[%s114_s3 + $0x8] sm:$0xff] %v45_v17 }
   0xb   :  { %50 = vst [vmem:[%s114_s3 + $0x10] sm:$0xff] %v46_v18  ;;  %51 = vst [vmem:[%s114_s3 + $0x18] sm:$0xff] %v47_v19 }

</bundles_post_ra>
